<compile_context>
chip_gen: v5e
topology: v5e:2x2
jax: 0.10.0
libtpu: 0.0.40
codegen_flags: <defaults>
</compile_context>

<pallas_src>
import functools

import jax
import jax.numpy as jnp
import numpy as np
from jax import lax
from jax.experimental import pallas as pl
from jax.experimental.pallas import tpu as pltpu


# ----------------------------------------------------------------------------
# Fused kernel: one batch element per grid step.
# Refs (values are (channels, flattened-spatial); spatial on the lane axis):
#   tgt      (4*HW1, 1)  i32   scatter target pixel for (kk, p1) of the 2x2 shuffle
#   upmask   (1, HW2)          where upsampled data (and its bias) lands
#   wup      (4*C1up, C1)      stacked transposed-conv taps, row = kk*C1up + co
#   bup      (C1up, 1)
#   w1f      (Cout1, 9*Cin1+1) fused conv1 weights, col = (di*3+dj)*Cin1 + ci | bias
#   w2f      (Cout2, 9*Cout1+1)
#   tapmask  (9, 1, HW2)       3x3 border-validity masks
#   x1       (1, C1, HW1)      NCHW flattened (per batch)
#   x2       (1, C2, HW2)
#   o        (1, Cout2, HW2)
# ----------------------------------------------------------------------------
def _up_fused_kernel(tgt_ref, upmask_ref, wup_ref, bup_ref, w1_ref, w2_ref,
                     tapmask_ref, x1_ref, x2_ref, o_ref,
                     *, W2, HW1, HW2, C1up):
    f32 = jnp.float32
    x1 = x1_ref[0]                                   # (C1,  HW1)
    x2 = x2_ref[0]                                   # (C2,  HW2)

    # --- ConvTranspose2d(k=2, s=2) + F.pad alignment, fused:
    #     (1) all four 2x2 taps in ONE small GEMM,
    #     (2) pixel-shuffle scatter as ONE K=4*HW1 GEMM against a one-hot
    #         selection matrix generated in-kernel (nothing big DMA'd).
    a = jnp.dot(wup_ref[...], x1, preferred_element_type=f32)       # (4*C1up, HW1)
    a_cat = jnp.concatenate(
        [a[k * C1up:(k + 1) * C1up] for k in range(4)], axis=1)     # (C1up, 4*HW1)
    col = lax.broadcasted_iota(jnp.int32, (4 * HW1, HW2), 1)
    sel = (col == tgt_ref[...]).astype(f32)                         # (4*HW1, HW2)
    u = jnp.dot(a_cat, sel, preferred_element_type=f32)             # (C1up, HW2)
    u = u + bup_ref[...] * upmask_ref[...]        # bias only where real data lands

    # --- torch.cat([x2, up(x1)], dim=1): one full f32 sublane group, never
    #     round-tripped to HBM.
    xc = jnp.concatenate([x2, u], axis=0)                           # (Cin1, HW2)

    # shifted + masked tap: output pixel p reads input pixel p + s; pixels
    # outside the image are zeroed by the precomputed border mask (the
    # circular wrap of the roll only ever lands on masked positions).
    def shifted(x, t):
        s = (t // 3 - 1) * W2 + (t % 3 - 1)
        if s == 0:
            return x                                 # center tap: always in-bounds
        return pltpu.roll(x, (-s) % HW2, axis=1) * tapmask_ref[t]

    ones_row = jnp.ones((1, HW2), f32)

    # --- conv1 (3x3 pad=1, BN folded, ReLU): in-VMEM im2col -> ONE GEMM, K=9*Cin1+1.
    xs = jnp.concatenate([shifted(xc, t) for t in range(9)] + [ones_row], axis=0)
    a1 = jnp.maximum(jnp.dot(w1_ref[...], xs, preferred_element_type=f32), 0.0)

    # --- conv2 (3x3 pad=1, BN folded, ReLU): same trick, K=9*Cout1+1.
    a1s = jnp.concatenate([shifted(a1, t) for t in range(9)] + [ones_row], axis=0)
    o = jnp.maximum(jnp.dot(w2_ref[...], a1s, preferred_element_type=f32), 0.0)
    o_ref[0] = o.astype(o_ref.dtype)


# ----------------------------------------------------------------------------
# Wrapper: weight fusion / constant building + one pallas_call.
# ----------------------------------------------------------------------------
def up_forward(x1_nchw, x2_nchw, params, eps=1e-5):
    N, C1, H1, W1 = x1_nchw.shape
    assert x2_nchw.shape[0] == N
    _, C2, H2, W2 = x2_nchw.shape
    HW1, HW2 = H1 * W1, H2 * W2

    diffY, diffX = H2 - 2 * H1, W2 - 2 * W1
    # TODO(synk): negative diffY/diffX (cropping) unsupported; standard UNet has diff >= 0.
    assert diffY >= 0 and diffX >= 0
    py, px = diffY // 2, diffX // 2

    C1up = params["up_w"].shape[1]
    Cin1 = C2 + C1up
    Cout1 = params["c1_w"].shape[0]
    Cout2 = params["c2_w"].shape[0]
    assert params["c1_w"].shape[1] == Cin1

    # ---- tiny int32 scatter targets (replaces the old 256 KiB f32 one-hot
    #      matrix; the one-hot is rebuilt in-kernel from iota).
    targets = np.zeros((4 * HW1, 1), np.int32)
    upmask = np.zeros((1, HW2), np.float32)
    for ki in range(2):
        for kj in range(2):
            kk = ki * 2 + kj
            for i in range(H1):
                for j in range(W1):
                    t = (2 * i + ki + py) * W2 + (2 * j + kj + px)
                    targets[kk * HW1 + i * W1 + j, 0] = t
                    upmask[0, t] = 1.0

    # ---- 3x3 border-validity masks (lane-dense, ~9 KiB).
    ii, jj = np.divmod(np.arange(HW2), W2)
    tapmask = np.zeros((9, 1, HW2), np.float32)
    for di in range(3):
        for dj in range(3):
            oy, ox = di - 1, dj - 1
            ok = (ii + oy >= 0) & (ii + oy < H2) & (jj + ox >= 0) & (jj + ox < W2)
            tapmask[di * 3 + dj, 0, :] = ok.astype(np.float32)

    # ---- fold eval-mode BN into conv weights/biases; fuse all 9 taps into a
    #      single lane-dense weight slab per conv, bias as trailing column.
    def fold(w, b, g, be, m, v):
        s = g / jnp.sqrt(v + eps)
        return w * s[:, None, None, None], (b - m) * s + be

    wf1, bf1 = fold(params["c1_w"], params["c1_b"], params["bn1_g"],
                    params["bn1_b"], params["bn1_m"], params["bn1_v"])
    wf2, bf2 = fold(params["c2_w"], params["c2_b"], params["bn2_g"],
                    params["bn2_b"], params["bn2_m"], params["bn2_v"])

    def fuse(w, b):   # (Co,Ci,3,3),(Co,) -> (Co, 9*Ci+1); col = (di*3+dj)*Ci + ci
        Co, Ci = w.shape[0], w.shape[1]
        wt = jnp.transpose(w, (0, 2, 3, 1)).reshape(Co, 9 * Ci)
        return jnp.concatenate([wt, b[:, None]], axis=1)

    w1f = fuse(wf1, bf1)                               # (Cout1, 9*Cin1 + 1)
    w2f = fuse(wf2, bf2)                               # (Cout2, 9*Cout1 + 1)
    # ConvTranspose2d weight (Cin, Cout, 2, 2) -> (4*Cout, Cin), row = (ki*2+kj)*Cout + co
    wup = jnp.transpose(params["up_w"], (2, 3, 1, 0)).reshape(4 * C1up, C1)
    bup = params["up_b"].reshape(C1up, 1)

    kernel = functools.partial(_up_fused_kernel, W2=W2, HW1=HW1, HW2=HW2, C1up=C1up)
    out = pl.pallas_call(
        kernel,
        out_shape=jax.ShapeDtypeStruct((N, Cout2, HW2), jnp.float32),
        grid=(N,),
        in_specs=[
            pl.BlockSpec((4 * HW1, 1), lambda n: (0, 0)),            # scatter targets
            pl.BlockSpec((1, HW2), lambda n: (0, 0)),                # upmask
            pl.BlockSpec((4 * C1up, C1), lambda n: (0, 0)),          # wup (stacked taps)
            pl.BlockSpec((C1up, 1), lambda n: (0, 0)),               # bup
            pl.BlockSpec((Cout1, 9 * Cin1 + 1), lambda n: (0, 0)),   # fused conv1 W|b
            pl.BlockSpec((Cout2, 9 * Cout1 + 1), lambda n: (0, 0)),  # fused conv2 W|b
            pl.BlockSpec((9, 1, HW2), lambda n: (0, 0, 0)),          # tap masks
            pl.BlockSpec((1, C1, HW1), lambda n: (n, 0, 0)),         # x1 (NCHW flat)
            pl.BlockSpec((1, C2, HW2), lambda n: (n, 0, 0)),         # x2 (NCHW flat)
        ],
        out_specs=pl.BlockSpec((1, Cout2, HW2), lambda n: (n, 0, 0)),
        compiler_params=pltpu.CompilerParams(
            dimension_semantics=("parallel",),          # batch across cores (v7x)
            vmem_limit_bytes=32 * 1024 * 1024,          # explicit, v7x-safe budget
        ),
    )(jnp.asarray(targets), jnp.asarray(upmask), wup, bup,
      w1f, w2f, jnp.asarray(tapmask),
      x1_nchw.reshape(N, C1, HW1),
      x2_nchw.reshape(N, C2, HW2))
    return out.reshape(N, Cout2, H2, W2)      # free reshape: already NCHW order


# ----------------------------------------------------------------------------
# Pure-JAX reference (lax convolutions, unfused BN) for correctness check
# ----------------------------------------------------------------------------
def ref_forward(x1, x2, p, eps=1e-5):
    N, C1, H, W = x1.shape
    Cout_up = p["up_w"].shape[1]
    # ConvTranspose2d(k=2, s=2): y[n,co,2i+ki,2j+kj] = sum_ci x[n,ci,i,j] W[ci,co,ki,kj] + b
    y = jnp.einsum("ncij,cdkl->ndikjl", x1, p["up_w"])
    y = y.reshape(N, Cout_up, 2 * H, 2 * W) + p["up_b"][None, :, None, None]

    diffY = x2.shape[2] - y.shape[2]
    diffX = x2.shape[3] - y.shape[3]
    y = jnp.pad(y, ((0, 0), (0, 0),
                    (diffY // 2, diffY - diffY // 2),
                    (diffX // 2, diffX - diffX // 2)))
    x = jnp.concatenate([x2, y], axis=1)

    def cbr(x, w, b, g, be, m, v):
        o = lax.conv_general_dilated(x, w, (1, 1), ((1, 1), (1, 1)),
                                     dimension_numbers=("NCHW", "OIHW", "NCHW"))
        o = o + b[None, :, None, None]
        o = (o - m[None, :, None, None]) / jnp.sqrt(v[None, :, None, None] + eps)
        o = o * g[None, :, None, None] + be[None, :, None, None]
        return jnp.maximum(o, 0.0)

    x = cbr(x, p["c1_w"], p["c1_b"], p["bn1_g"], p["bn1_b"], p["bn1_m"], p["bn1_v"])
    x = cbr(x, p["c2_w"], p["c2_b"], p["bn2_g"], p["bn2_b"], p["bn2_m"], p["bn2_v"])
    return x


# ----------------------------------------------------------------------------
# Main
# ----------------------------------------------------------------------------
if __name__ == "__main__":
    in_ch, out_ch = 8, 4           # Up(in_ch=8, out_ch=4, conv_block=double_conv)
    C1 = in_ch // 2                # channels of x1 (and of the transposed conv)
    N, H1, W1 = 2, 8, 8            # x1 spatial
    H2, W2 = 16, 16                # x2 spatial (2x of x1)

    key = jax.random.PRNGKey(0)
    ks = jax.random.split(key, 16)

    x1 = jax.random.normal(ks[0], (N, C1, H1, W1), jnp.float32)
    x2 = jax.random.normal(ks[1], (N, in_ch - C1, H2, W2), jnp.float32)

    params = {
        # ConvTranspose2d(C1, C1, 2, stride=2): weight (Cin, Cout, 2, 2)
        "up_w": 0.2 * jax.random.normal(ks[2], (C1, C1, 2, 2), jnp.float32),
        "up_b": 0.1 * jax.random.normal(ks[3], (C1,), jnp.float32),
        # double_conv: Conv2d(in_ch, out_ch, 3, pad=1) + BN + ReLU
        "c1_w": 0.2 * jax.random.normal(ks[4], (out_ch, in_ch, 3, 3), jnp.float32),
        "c1_b": 0.1 * jax.random.normal(ks[5], (out_ch,), jnp.float32),
        "bn1_g": 1.0 + 0.1 * jax.random.normal(ks[6], (out_ch,), jnp.float32),
        "bn1_b": 0.1 * jax.random.normal(ks[7], (out_ch,), jnp.float32),
        "bn1_m": 0.05 * jax.random.normal(ks[8], (out_ch,), jnp.float32),
        "bn1_v": 1.0 + 0.2 * jax.random.uniform(ks[9], (out_ch,), jnp.float32),
        # Conv2d(out_ch, out_ch, 3, pad=1) + BN + ReLU
        "c2_w": 0.2 * jax.random.normal(ks[10], (out_ch, out_ch, 3, 3), jnp.float32),
        "c2_b": 0.1 * jax.random.normal(ks[11], (out_ch,), jnp.float32),
        "bn2_g": 1.0 + 0.1 * jax.random.normal(ks[12], (out_ch,), jnp.float32),
        "bn2_b": 0.1 * jax.random.normal(ks[13], (out_ch,), jnp.float32),
        "bn2_m": 0.05 * jax.random.normal(ks[14], (out_ch,), jnp.float32),
        "bn2_v": 1.0 + 0.2 * jax.random.uniform(ks[15], (out_ch,), jnp.float32),
    }

    out = jax.jit(up_forward)(x1, x2, params)
    out = jax.block_until_ready(out)

    ref = jax.block_until_ready(ref_forward(x1, x2, params))
    assert out.shape == (N, out_ch, H2, W2), out.shape
    np.testing.assert_allclose(np.asarray(out), np.asarray(ref), rtol=1e-4, atol=1e-4)

    print("KERNEL_OK")
</pallas_src>

<mosaic_0001>
module attributes {stable_mosaic.version = 11 : i64} {
  func.func @_up_fused_kernel(%arg0: i32, %arg1: memref<256x1xi32, #tpu.memory_space<vmem>>, %arg2: memref<1x256xf32, #tpu.memory_space<vmem>>, %arg3: memref<16x4xf32, #tpu.memory_space<vmem>>, %arg4: memref<4x1xf32, #tpu.memory_space<vmem>>, %arg5: memref<4x73xf32, #tpu.memory_space<vmem>>, %arg6: memref<4x37xf32, #tpu.memory_space<vmem>>, %arg7: memref<9x1x256xf32, #tpu.memory_space<vmem>>, %arg8: memref<1x4x64xf32, #tpu.memory_space<vmem>>, %arg9: memref<1x4x256xf32, #tpu.memory_space<vmem>>, %arg10: memref<1x4x256xf32, #tpu.memory_space<vmem>>) attributes {dimension_semantics = [#tpu.dimension_semantics<parallel>], iteration_bounds = array<i64: 2>, scalar_prefetch = 0 : i64, scratch_operands = 0 : i64, tpu.core_type = #tpu.core_type<tc>, window_params = [{pipeline_mode = #tpu.pipeline_mode<synchronous>, transform_indices = @transform_0, window_bounds = array<i64: 256, 1>}, {pipeline_mode = #tpu.pipeline_mode<synchronous>, transform_indices = @transform_1, window_bounds = array<i64: 1, 256>}, {pipeline_mode = #tpu.pipeline_mode<synchronous>, transform_indices = @transform_2, window_bounds = array<i64: 16, 4>}, {pipeline_mode = #tpu.pipeline_mode<synchronous>, transform_indices = @transform_3, window_bounds = array<i64: 4, 1>}, {pipeline_mode = #tpu.pipeline_mode<synchronous>, transform_indices = @transform_4, window_bounds = array<i64: 4, 73>}, {pipeline_mode = #tpu.pipeline_mode<synchronous>, transform_indices = @transform_5, window_bounds = array<i64: 4, 37>}, {pipeline_mode = #tpu.pipeline_mode<synchronous>, transform_indices = @transform_6, window_bounds = array<i64: 9, 1, 256>}, {transform_indices = @transform_7, window_bounds = array<i64: 1, 4, 64>}, {transform_indices = @transform_8, window_bounds = array<i64: 1, 4, 256>}, {transform_indices = @transform_9, window_bounds = array<i64: 1, 4, 256>}]} {
    %c0 = arith.constant 0 : index
    %c0_0 = arith.constant 0 : index
    %c0_1 = arith.constant 0 : index
    %0 = vector.load %arg8[%c0, %c0_0, %c0_1] : memref<1x4x64xf32, #tpu.memory_space<vmem>>, vector<1x4x64xf32>
    %1 = vector.shape_cast %0 : vector<1x4x64xf32> to vector<4x64xf32>
    %c0_2 = arith.constant 0 : index
    %c0_3 = arith.constant 0 : index
    %c0_4 = arith.constant 0 : index
    %2 = vector.load %arg9[%c0_2, %c0_3, %c0_4] : memref<1x4x256xf32, #tpu.memory_space<vmem>>, vector<1x4x256xf32>
    %3 = vector.shape_cast %2 : vector<1x4x256xf32> to vector<4x256xf32>
    %c0_5 = arith.constant 0 : index
    %c0_6 = arith.constant 0 : index
    %4 = vector.load %arg3[%c0_5, %c0_6] : memref<16x4xf32, #tpu.memory_space<vmem>>, vector<16x4xf32>
    %cst = arith.constant dense<0.000000e+00> : vector<16x64xf32>
    %5 = tpu.matmul %4, %1, %cst {dimension_numbers = #tpu.dot_dimension_numbers<[1], [0], [0], [1], [0, 0, 1, 1], [], []>} : vector<16x4xf32>, vector<4x64xf32>, vector<16x64xf32> -> vector<16x64xf32>
    %6 = vector.extract_strided_slice %5 {offsets = [0, 0], sizes = [4, 64], strides = [1, 1]} : vector<16x64xf32> to vector<4x64xf32>
    %7 = vector.extract_strided_slice %5 {offsets = [4, 0], sizes = [4, 64], strides = [1, 1]} : vector<16x64xf32> to vector<4x64xf32>
    %8 = vector.extract_strided_slice %5 {offsets = [8, 0], sizes = [4, 64], strides = [1, 1]} : vector<16x64xf32> to vector<4x64xf32>
    %9 = vector.extract_strided_slice %5 {offsets = [12, 0], sizes = [4, 64], strides = [1, 1]} : vector<16x64xf32> to vector<4x64xf32>
    %10 = tpu.concatenate %6, %7, %8, %9 in 1 : vector<4x64xf32>, vector<4x64xf32>, vector<4x64xf32>, vector<4x64xf32> -> vector<4x256xf32>
    %11 = tpu.iota {dimensions = array<i32: 1>} : vector<256x256xi32>
    %c0_7 = arith.constant 0 : index
    %c0_8 = arith.constant 0 : index
    %12 = vector.load %arg1[%c0_7, %c0_8] : memref<256x1xi32, #tpu.memory_space<vmem>>, vector<256x1xi32>
    %13 = vector.broadcast %12 : vector<256x1xi32> to vector<256x256xi32>
    %14 = arith.cmpi eq, %11, %13 : vector<256x256xi32>
    %15 = arith.extui %14 : vector<256x256xi1> to vector<256x256xi32>
    %16 = arith.sitofp %15 : vector<256x256xi32> to vector<256x256xf32>
    %cst_9 = arith.constant dense<0.000000e+00> : vector<4x256xf32>
    %17 = tpu.matmul %10, %16, %cst_9 {dimension_numbers = #tpu.dot_dimension_numbers<[1], [0], [0], [1], [0, 0, 1, 1], [], []>} : vector<4x256xf32>, vector<256x256xf32>, vector<4x256xf32> -> vector<4x256xf32>
    %c0_10 = arith.constant 0 : index
    %c0_11 = arith.constant 0 : index
    %18 = vector.load %arg4[%c0_10, %c0_11] : memref<4x1xf32, #tpu.memory_space<vmem>>, vector<4x1xf32>
    %c0_12 = arith.constant 0 : index
    %c0_13 = arith.constant 0 : index
    %19 = vector.load %arg2[%c0_12, %c0_13] : memref<1x256xf32, #tpu.memory_space<vmem>>, vector<1x256xf32>
    %20 = vector.broadcast %18 : vector<4x1xf32> to vector<4x256xf32>
    %21 = vector.broadcast %19 : vector<1x256xf32> to vector<4x256xf32>
    %22 = arith.mulf %20, %21 : vector<4x256xf32>
    %23 = arith.addf %17, %22 : vector<4x256xf32>
    %24 = tpu.concatenate %3, %23 in 0 : vector<4x256xf32>, vector<4x256xf32> -> vector<8x256xf32>
    %cst_14 = arith.constant 1.000000e+00 : f32
    %25 = vector.broadcast %cst_14 : f32 to vector<1x256xf32>
    %c17_i32 = arith.constant 17 : i32
    %26 = tpu.dynamic_rotate %24 by %c17_i32 dim 1 : vector<8x256xf32>, i32 -> vector<8x256xf32>
    %c0_15 = arith.constant 0 : index
    %c0_16 = arith.constant 0 : index
    %c0_17 = arith.constant 0 : index
    %27 = vector.load %arg7[%c0_15, %c0_16, %c0_17] : memref<9x1x256xf32, #tpu.memory_space<vmem>>, vector<1x1x256xf32>
    %28 = vector.shape_cast %27 : vector<1x1x256xf32> to vector<1x256xf32>
    %29 = vector.broadcast %28 : vector<1x256xf32> to vector<8x256xf32>
    %30 = arith.mulf %26, %29 : vector<8x256xf32>
    %c16_i32 = arith.constant 16 : i32
    %31 = tpu.dynamic_rotate %24 by %c16_i32 dim 1 : vector<8x256xf32>, i32 -> vector<8x256xf32>
    %c1 = arith.constant 1 : index
    %c0_18 = arith.constant 0 : index
    %c0_19 = arith.constant 0 : index
    %32 = vector.load %arg7[%c1, %c0_18, %c0_19] : memref<9x1x256xf32, #tpu.memory_space<vmem>>, vector<1x1x256xf32>
    %33 = vector.shape_cast %32 : vector<1x1x256xf32> to vector<1x256xf32>
    %34 = vector.broadcast %33 : vector<1x256xf32> to vector<8x256xf32>
    %35 = arith.mulf %31, %34 : vector<8x256xf32>
    %c15_i32 = arith.constant 15 : i32
    %36 = tpu.dynamic_rotate %24 by %c15_i32 dim 1 : vector<8x256xf32>, i32 -> vector<8x256xf32>
    %c2 = arith.constant 2 : index
    %c0_20 = arith.constant 0 : index
    %c0_21 = arith.constant 0 : index
    %37 = vector.load %arg7[%c2, %c0_20, %c0_21] : memref<9x1x256xf32, #tpu.memory_space<vmem>>, vector<1x1x256xf32>
    %38 = vector.shape_cast %37 : vector<1x1x256xf32> to vector<1x256xf32>
    %39 = vector.broadcast %38 : vector<1x256xf32> to vector<8x256xf32>
    %40 = arith.mulf %36, %39 : vector<8x256xf32>
    %c1_i32 = arith.constant 1 : i32
    %41 = tpu.dynamic_rotate %24 by %c1_i32 dim 1 : vector<8x256xf32>, i32 -> vector<8x256xf32>
    %c3 = arith.constant 3 : index
    %c0_22 = arith.constant 0 : index
    %c0_23 = arith.constant 0 : index
    %42 = vector.load %arg7[%c3, %c0_22, %c0_23] : memref<9x1x256xf32, #tpu.memory_space<vmem>>, vector<1x1x256xf32>
    %43 = vector.shape_cast %42 : vector<1x1x256xf32> to vector<1x256xf32>
    %44 = vector.broadcast %43 : vector<1x256xf32> to vector<8x256xf32>
    %45 = arith.mulf %41, %44 : vector<8x256xf32>
    %c255_i32 = arith.constant 255 : i32
    %46 = tpu.dynamic_rotate %24 by %c255_i32 dim 1 : vector<8x256xf32>, i32 -> vector<8x256xf32>
    %c5 = arith.constant 5 : index
    %c0_24 = arith.constant 0 : index
    %c0_25 = arith.constant 0 : index
    %47 = vector.load %arg7[%c5, %c0_24, %c0_25] : memref<9x1x256xf32, #tpu.memory_space<vmem>>, vector<1x1x256xf32>
    %48 = vector.shape_cast %47 : vector<1x1x256xf32> to vector<1x256xf32>
    %49 = vector.broadcast %48 : vector<1x256xf32> to vector<8x256xf32>
    %50 = arith.mulf %46, %49 : vector<8x256xf32>
    %c241_i32 = arith.constant 241 : i32
    %51 = tpu.dynamic_rotate %24 by %c241_i32 dim 1 : vector<8x256xf32>, i32 -> vector<8x256xf32>
    %c6 = arith.constant 6 : index
    %c0_26 = arith.constant 0 : index
    %c0_27 = arith.constant 0 : index
    %52 = vector.load %arg7[%c6, %c0_26, %c0_27] : memref<9x1x256xf32, #tpu.memory_space<vmem>>, vector<1x1x256xf32>
    %53 = vector.shape_cast %52 : vector<1x1x256xf32> to vector<1x256xf32>
    %54 = vector.broadcast %53 : vector<1x256xf32> to vector<8x256xf32>
    %55 = arith.mulf %51, %54 : vector<8x256xf32>
    %c240_i32 = arith.constant 240 : i32
    %56 = tpu.dynamic_rotate %24 by %c240_i32 dim 1 : vector<8x256xf32>, i32 -> vector<8x256xf32>
    %c7 = arith.constant 7 : index
    %c0_28 = arith.constant 0 : index
    %c0_29 = arith.constant 0 : index
    %57 = vector.load %arg7[%c7, %c0_28, %c0_29] : memref<9x1x256xf32, #tpu.memory_space<vmem>>, vector<1x1x256xf32>
    %58 = vector.shape_cast %57 : vector<1x1x256xf32> to vector<1x256xf32>
    %59 = vector.broadcast %58 : vector<1x256xf32> to vector<8x256xf32>
    %60 = arith.mulf %56, %59 : vector<8x256xf32>
    %c239_i32 = arith.constant 239 : i32
    %61 = tpu.dynamic_rotate %24 by %c239_i32 dim 1 : vector<8x256xf32>, i32 -> vector<8x256xf32>
    %c8 = arith.constant 8 : index
    %c0_30 = arith.constant 0 : index
    %c0_31 = arith.constant 0 : index
    %62 = vector.load %arg7[%c8, %c0_30, %c0_31] : memref<9x1x256xf32, #tpu.memory_space<vmem>>, vector<1x1x256xf32>
    %63 = vector.shape_cast %62 : vector<1x1x256xf32> to vector<1x256xf32>
    %64 = vector.broadcast %63 : vector<1x256xf32> to vector<8x256xf32>
    %65 = arith.mulf %61, %64 : vector<8x256xf32>
    %66 = tpu.concatenate %30, %35, %40, %45, %24, %50, %55, %60, %65, %25 in 0 : vector<8x256xf32>, vector<8x256xf32>, vector<8x256xf32>, vector<8x256xf32>, vector<8x256xf32>, vector<8x256xf32>, vector<8x256xf32>, vector<8x256xf32>, vector<8x256xf32>, vector<1x256xf32> -> vector<73x256xf32>
    %c0_32 = arith.constant 0 : index
    %c0_33 = arith.constant 0 : index
    %67 = vector.load %arg5[%c0_32, %c0_33] : memref<4x73xf32, #tpu.memory_space<vmem>>, vector<4x73xf32>
    %cst_34 = arith.constant dense<0.000000e+00> : vector<4x256xf32>
    %68 = tpu.matmul %67, %66, %cst_34 {dimension_numbers = #tpu.dot_dimension_numbers<[1], [0], [0], [1], [0, 0, 1, 1], [], []>} : vector<4x73xf32>, vector<73x256xf32>, vector<4x256xf32> -> vector<4x256xf32>
    %cst_35 = arith.constant 0.000000e+00 : f32
    %69 = vector.broadcast %cst_35 : f32 to vector<4x256xf32>
    %70 = arith.maximumf %68, %69 : vector<4x256xf32>
    %c17_i32_36 = arith.constant 17 : i32
    %71 = tpu.dynamic_rotate %70 by %c17_i32_36 dim 1 : vector<4x256xf32>, i32 -> vector<4x256xf32>
    %c0_37 = arith.constant 0 : index
    %c0_38 = arith.constant 0 : index
    %c0_39 = arith.constant 0 : index
    %72 = vector.load %arg7[%c0_37, %c0_38, %c0_39] : memref<9x1x256xf32, #tpu.memory_space<vmem>>, vector<1x1x256xf32>
    %73 = vector.shape_cast %72 : vector<1x1x256xf32> to vector<1x256xf32>
    %74 = vector.broadcast %73 : vector<1x256xf32> to vector<4x256xf32>
    %75 = arith.mulf %71, %74 : vector<4x256xf32>
    %c16_i32_40 = arith.constant 16 : i32
    %76 = tpu.dynamic_rotate %70 by %c16_i32_40 dim 1 : vector<4x256xf32>, i32 -> vector<4x256xf32>
    %c1_41 = arith.constant 1 : index
    %c0_42 = arith.constant 0 : index
    %c0_43 = arith.constant 0 : index
    %77 = vector.load %arg7[%c1_41, %c0_42, %c0_43] : memref<9x1x256xf32, #tpu.memory_space<vmem>>, vector<1x1x256xf32>
    %78 = vector.shape_cast %77 : vector<1x1x256xf32> to vector<1x256xf32>
    %79 = vector.broadcast %78 : vector<1x256xf32> to vector<4x256xf32>
    %80 = arith.mulf %76, %79 : vector<4x256xf32>
    %c15_i32_44 = arith.constant 15 : i32
    %81 = tpu.dynamic_rotate %70 by %c15_i32_44 dim 1 : vector<4x256xf32>, i32 -> vector<4x256xf32>
    %c2_45 = arith.constant 2 : index
    %c0_46 = arith.constant 0 : index
    %c0_47 = arith.constant 0 : index
    %82 = vector.load %arg7[%c2_45, %c0_46, %c0_47] : memref<9x1x256xf32, #tpu.memory_space<vmem>>, vector<1x1x256xf32>
    %83 = vector.shape_cast %82 : vector<1x1x256xf32> to vector<1x256xf32>
    %84 = vector.broadcast %83 : vector<1x256xf32> to vector<4x256xf32>
    %85 = arith.mulf %81, %84 : vector<4x256xf32>
    %c1_i32_48 = arith.constant 1 : i32
    %86 = tpu.dynamic_rotate %70 by %c1_i32_48 dim 1 : vector<4x256xf32>, i32 -> vector<4x256xf32>
    %c3_49 = arith.constant 3 : index
    %c0_50 = arith.constant 0 : index
    %c0_51 = arith.constant 0 : index
    %87 = vector.load %arg7[%c3_49, %c0_50, %c0_51] : memref<9x1x256xf32, #tpu.memory_space<vmem>>, vector<1x1x256xf32>
    %88 = vector.shape_cast %87 : vector<1x1x256xf32> to vector<1x256xf32>
    %89 = vector.broadcast %88 : vector<1x256xf32> to vector<4x256xf32>
    %90 = arith.mulf %86, %89 : vector<4x256xf32>
    %c255_i32_52 = arith.constant 255 : i32
    %91 = tpu.dynamic_rotate %70 by %c255_i32_52 dim 1 : vector<4x256xf32>, i32 -> vector<4x256xf32>
    %c5_53 = arith.constant 5 : index
    %c0_54 = arith.constant 0 : index
    %c0_55 = arith.constant 0 : index
    %92 = vector.load %arg7[%c5_53, %c0_54, %c0_55] : memref<9x1x256xf32, #tpu.memory_space<vmem>>, vector<1x1x256xf32>
    %93 = vector.shape_cast %92 : vector<1x1x256xf32> to vector<1x256xf32>
    %94 = vector.broadcast %93 : vector<1x256xf32> to vector<4x256xf32>
    %95 = arith.mulf %91, %94 : vector<4x256xf32>
    %c241_i32_56 = arith.constant 241 : i32
    %96 = tpu.dynamic_rotate %70 by %c241_i32_56 dim 1 : vector<4x256xf32>, i32 -> vector<4x256xf32>
    %c6_57 = arith.constant 6 : index
    %c0_58 = arith.constant 0 : index
    %c0_59 = arith.constant 0 : index
    %97 = vector.load %arg7[%c6_57, %c0_58, %c0_59] : memref<9x1x256xf32, #tpu.memory_space<vmem>>, vector<1x1x256xf32>
    %98 = vector.shape_cast %97 : vector<1x1x256xf32> to vector<1x256xf32>
    %99 = vector.broadcast %98 : vector<1x256xf32> to vector<4x256xf32>
    %100 = arith.mulf %96, %99 : vector<4x256xf32>
    %c240_i32_60 = arith.constant 240 : i32
    %101 = tpu.dynamic_rotate %70 by %c240_i32_60 dim 1 : vector<4x256xf32>, i32 -> vector<4x256xf32>
    %c7_61 = arith.constant 7 : index
    %c0_62 = arith.constant 0 : index
    %c0_63 = arith.constant 0 : index
    %102 = vector.load %arg7[%c7_61, %c0_62, %c0_63] : memref<9x1x256xf32, #tpu.memory_space<vmem>>, vector<1x1x256xf32>
    %103 = vector.shape_cast %102 : vector<1x1x256xf32> to vector<1x256xf32>
    %104 = vector.broadcast %103 : vector<1x256xf32> to vector<4x256xf32>
    %105 = arith.mulf %101, %104 : vector<4x256xf32>
    %c239_i32_64 = arith.constant 239 : i32
    %106 = tpu.dynamic_rotate %70 by %c239_i32_64 dim 1 : vector<4x256xf32>, i32 -> vector<4x256xf32>
    %c8_65 = arith.constant 8 : index
    %c0_66 = arith.constant 0 : index
    %c0_67 = arith.constant 0 : index
    %107 = vector.load %arg7[%c8_65, %c0_66, %c0_67] : memref<9x1x256xf32, #tpu.memory_space<vmem>>, vector<1x1x256xf32>
    %108 = vector.shape_cast %107 : vector<1x1x256xf32> to vector<1x256xf32>
    %109 = vector.broadcast %108 : vector<1x256xf32> to vector<4x256xf32>
    %110 = arith.mulf %106, %109 : vector<4x256xf32>
    %111 = tpu.concatenate %75, %80, %85, %90, %70, %95, %100, %105, %110, %25 in 0 : vector<4x256xf32>, vector<4x256xf32>, vector<4x256xf32>, vector<4x256xf32>, vector<4x256xf32>, vector<4x256xf32>, vector<4x256xf32>, vector<4x256xf32>, vector<4x256xf32>, vector<1x256xf32> -> vector<37x256xf32>
    %c0_68 = arith.constant 0 : index
    %c0_69 = arith.constant 0 : index
    %112 = vector.load %arg6[%c0_68, %c0_69] : memref<4x37xf32, #tpu.memory_space<vmem>>, vector<4x37xf32>
    %cst_70 = arith.constant dense<0.000000e+00> : vector<4x256xf32>
    %113 = tpu.matmul %112, %111, %cst_70 {dimension_numbers = #tpu.dot_dimension_numbers<[1], [0], [0], [1], [0, 0, 1, 1], [], []>} : vector<4x37xf32>, vector<37x256xf32>, vector<4x256xf32> -> vector<4x256xf32>
    %cst_71 = arith.constant 0.000000e+00 : f32
    %114 = vector.broadcast %cst_71 : f32 to vector<4x256xf32>
    %115 = arith.maximumf %113, %114 : vector<4x256xf32>
    %c0_72 = arith.constant 0 : index
    %c0_73 = arith.constant 0 : index
    %c0_74 = arith.constant 0 : index
    %116 = vector.load %arg10[%c0_72, %c0_73, %c0_74] : memref<1x4x256xf32, #tpu.memory_space<vmem>>, vector<1x4x256xf32>
    %117 = vector.shape_cast %116 : vector<1x4x256xf32> to vector<4x256xf32>
    %118 = vector.shape_cast %115 : vector<4x256xf32> to vector<1x4x256xf32>
    tpu.vector_store %arg10[%c0_72, %c0_73, %c0_74], %118 {strides = array<i32>} : memref<1x4x256xf32, #tpu.memory_space<vmem>>, vector<1x4x256xf32>,
    return
  }
  func.func @transform_0(%arg0: i32) -> (i32, i32) {
    %c0_i32 = arith.constant 0 : i32
    %c0_i32_0 = arith.constant 0 : i32
    %c0_i32_1 = arith.constant 0 : i32
    return %c0_i32, %c0_i32_0 : i32, i32
  }
  func.func @transform_1(%arg0: i32) -> (i32, i32) {
    %c0_i32 = arith.constant 0 : i32
    %c0_i32_0 = arith.constant 0 : i32
    %c0_i32_1 = arith.constant 0 : i32
    return %c0_i32, %c0_i32_0 : i32, i32
  }
  func.func @transform_2(%arg0: i32) -> (i32, i32) {
    %c0_i32 = arith.constant 0 : i32
    %c0_i32_0 = arith.constant 0 : i32
    %c0_i32_1 = arith.constant 0 : i32
    return %c0_i32, %c0_i32_0 : i32, i32
  }
  func.func @transform_3(%arg0: i32) -> (i32, i32) {
    %c0_i32 = arith.constant 0 : i32
    %c0_i32_0 = arith.constant 0 : i32
    %c0_i32_1 = arith.constant 0 : i32
    return %c0_i32, %c0_i32_0 : i32, i32
  }
  func.func @transform_4(%arg0: i32) -> (i32, i32) {
    %c0_i32 = arith.constant 0 : i32
    %c0_i32_0 = arith.constant 0 : i32
    %c0_i32_1 = arith.constant 0 : i32
    return %c0_i32, %c0_i32_0 : i32, i32
  }
  func.func @transform_5(%arg0: i32) -> (i32, i32) {
    %c0_i32 = arith.constant 0 : i32
    %c0_i32_0 = arith.constant 0 : i32
    %c0_i32_1 = arith.constant 0 : i32
    return %c0_i32, %c0_i32_0 : i32, i32
  }
  func.func @transform_6(%arg0: i32) -> (i32, i32, i32) {
    %c0_i32 = arith.constant 0 : i32
    %c0_i32_0 = arith.constant 0 : i32
    %c0_i32_1 = arith.constant 0 : i32
    %c0_i32_2 = arith.constant 0 : i32
    return %c0_i32, %c0_i32_0, %c0_i32_1 : i32, i32, i32
  }
  func.func @transform_7(%arg0: i32) -> (i32, i32, i32) {
    %c0_i32 = arith.constant 0 : i32
    %c0_i32_0 = arith.constant 0 : i32
    %c0_i32_1 = arith.constant 0 : i32
    return %arg0, %c0_i32, %c0_i32_0 : i32, i32, i32
  }
  func.func @transform_8(%arg0: i32) -> (i32, i32, i32) {
    %c0_i32 = arith.constant 0 : i32
    %c0_i32_0 = arith.constant 0 : i32
    %c0_i32_1 = arith.constant 0 : i32
    return %arg0, %c0_i32, %c0_i32_0 : i32, i32, i32
  }
  func.func @transform_9(%arg0: i32) -> (i32, i32, i32) {
    %c0_i32 = arith.constant 0 : i32
    %c0_i32_0 = arith.constant 0 : i32
    %c0_i32_1 = arith.constant 0 : i32
    return %arg0, %c0_i32, %c0_i32_0 : i32, i32, i32
  }
}

</mosaic_0001>

<bundles_post_ra>
// kernel: up_forward.1
= control target key start
LH: loop header
LB: loop body
LE: loop exit
PB: predicated region body
PF: predicated region fallthrough
CT: control target
= control target key end

     0   :  { %s1491_s30 = smov 0   ;;  %s2047_s0 = inlined_call_operand.vmem [shape: s32[256,1], index: 0, kind: input, shape index: {}]   ;;  %s2048_s1 = inlined_call_operand.vmem [shape: f32[1,256], index: 1, kind: input, shape index: {}]   ;;  %s2049_s2 = inlined_call_operand.vmem [shape: f32[16,4], index: 2, kind: input, shape index: {}]   ;;  %s2050_s3 = inlined_call_operand.vmem [shape: f32[4,1], index: 3, kind: input, shape index: {}]   ;;  %s2051_s4 = inlined_call_operand.vmem [shape: f32[4,73], index: 4, kind: input, shape index: {}]   ;;  %s2052_s5 = inlined_call_operand.vmem [shape: f32[4,37], index: 5, kind: input, shape index: {}]   ;;  %s2053_s6 = inlined_call_operand.vmem [shape: f32[9,1,256], index: 6, kind: input, shape index: {}]   ;;  %s2054_s7 = inlined_call_operand.vmem [shape: f32[2,4,64], index: 7, kind: input, shape index: {}]   ;;  %s2055_s8 = inlined_call_operand.vmem [shape: f32[2,4,256], index: 8, kind: input, shape index: {}]   ;;  %s2056_s9 = inlined_call_operand.vmem [shape: f32[2,4,256], index: 9, kind: output, shape index: {}]  }
   0x1 LB: > { %s1235_s10 = sadd.s32 4294967295, %s1428_s30   ;;  %p1239_p0 = scmp.ge.s32.totalorder %s1428_s30, 1  ;;  %s1428_s30 = sphi %s1491_s30, %s19_s30  }
   0x2   : > { %p296_p1 = scmp.lt.s32.totalorder %s1428_s30, 3 }
   0x4   : > { %p297_p2 = pnand %p1239_p0, %p296_p1 }
   0x5   : > { %p336_p3 = scmp.lt.s32.totalorder (!%p297_p2), %s1235_s10, 1  ;;  %s1432_s16 = smov (!%p297_p2), 64  }
   0x6   : > { %300 = sbr.rel (%p297_p2) target bundleno = 991 (0x3df), region = 56  ;;  %s1433_s20 = smov (!%p297_p2), 113  }
   0x7   : > { %s1435_s22 = smov (!%p297_p2), 111   ;;  %s1436_s23 = smov (!%p297_p2), 15  }
   0x8   : > { %s1438_s25 = smov (!%p297_p2), 127   ;;  %s1439_s26 = smov (!%p297_p2), 17  }
   0x9   : > { %s1440_s27 = smov (!%p297_p2), 16  }
   0xb   : > { %v435_v0 = vld [vmem:[%s2047_s0 + $0xf8] sm:$0xff]  ;;  %v1430_v2 = vmov 0   ;;  %s2058_s10 = smov (!%p336_p3, %s1235_s10), 1  ;;  %v434_v3 = vld [vmem:[%s2047_s0 + $0xf0] sm:$0xff]  ;;  %vm361_vm0 = vcmask 1043456   ;;  %v352_v4 = vld [vmem:[%s2049_s2] sm:$0xff]  ;;  %v401_v43 = vlaneseq }
   0xc   : > { %v419_v1 = vld [vmem:[%s2047_s0 + $0x78] sm:$0xff]  ;;  %1415 = vset.pattern.permute.xlu1 %v1430_v2  ;;  %1414 = vset.pattern.permute.xlu0 %v1430_v2  ;;  %s1240_s17 = sshll.u32 %s2058_s10, 2  ;;  %s1393_s18 = sshll.u32 %s2058_s10, 3  ;;  %vm354_vm1 = vcmask 31744   ;;  %v418_v7 = vld [vmem:[%s2047_s0 + $0x70] sm:$0xff]  ;;  %v417_v8 = vld [vmem:[%s2047_s0 + $0x68] sm:$0xff] }
   0xd   : > { %530 = vperm.xlu1 %1415, %v435_v0   ;;  %482 = vperm.xlu0 %1414, %v419_v1   ;;  %s339_s21 = scalar_lea.vmem %s2054_s7, %s1240_s17  ;;  %s344_s24 = scalar_lea.vmem %s2055_s8, %s1393_s18  ;;  %v416_v9 = vld [vmem:[%s2047_s0 + $0x60] sm:$0xff]  ;;  %v353_v10 = vld [vmem:[%s2049_s2 + $0x8] sm:$0xff]  ;;  %v415_v12 = vld [vmem:[%s2047_s0 + $0x58] sm:$0xff]  ;;  %v1617_v44 = vand.u32 127, %v401_v43  ;;  %v1431_v48 = vmov 1.0  }
   0xe   : > { %1416 = vset.pattern.permute.xlu2 %v1430_v2  ;;  %v350_v5 = vld [vmem:[%s339_s21] sm:$0xf]  ;;  %v433_v11 = vld [vmem:[%s2047_s0 + $0xe8] sm:$0xff]  ;;  %v431_v14 = vld [vmem:[%s2047_s0 + $0xd8] sm:$0xff]  ;;  %s1434_s21 = smov 112  }
   0xf   : > { %527 = vperm.xlu2 %1416, %v434_v3   ;;  %v351_v6 = vld [vmem:[%s344_s24] sm:$0xff]  ;;  %1245 = vmatpush.msk.msra.mxu0 %vm361_vm0, %v350_v5  ;;  %v414_v15 = vld [vmem:[%s2047_s0 + $0x50] sm:$0xff]  ;;  %v413_v16 = vld [vmem:[%s2047_s0 + $0x48] sm:$0xff]  ;;  %v1620_v45 = vadd.s32 128, %v1617_v44  ;;  %s1437_s24 = smov 1  }
  0x10   : > { %819 = vst [vmem:[#allocation1] ss:$2 sm:$0xff] %v351_v6  ;;  %1246 = vmatmul.msk.f32.vlgmr.msra.gmra.mxu0 %vm354_vm1, %v352_v4  ;;  %v432_v13 = vld [vmem:[%s2047_s0 + $0xe0] sm:$0xff]  ;;  %v430_v17 = vld [vmem:[%s2047_s0 + $0xd0] sm:$0xff]  ;;  %v429_v19 = vld [vmem:[%s2047_s0 + $0xc8] sm:$0xff] }
  0x11   : > { %v412_v18 = vld [vmem:[%s2047_s0 + $0x40] sm:$0xff]  ;;  %v411_v21 = vld [vmem:[%s2047_s0 + $0x38] sm:$0xff]  ;;  %v410_v22 = vld [vmem:[%s2047_s0 + $0x30] sm:$0xff] }
  0x12   : > { %v428_v20 = vld [vmem:[%s2047_s0 + $0xc0] sm:$0xff]  ;;  %v427_v23 = vld [vmem:[%s2047_s0 + $0xb8] sm:$0xff]  ;;  %v409_v24 = vld [vmem:[%s2047_s0 + $0x28] sm:$0xff] }
  0x13   : > { %v426_v25 = vld [vmem:[%s2047_s0 + $0xb0] sm:$0xff]  ;;  %v425_v26 = vld [vmem:[%s2047_s0 + $0xa8] sm:$0xff]  ;;  %v408_v27 = vld [vmem:[%s2047_s0 + $0x20] sm:$0xff] }
  0x14   : > { %v407_v28 = vld [vmem:[%s2047_s0 + $0x18] sm:$0xff]  ;;  %v424_v29 = vld [vmem:[%s2047_s0 + $0xa0] sm:$0xff]  ;;  %v406_v30 = vld [vmem:[%s2047_s0 + $0x10] sm:$0xff] }
  0x15   : > { %479 = vperm.xlu0 %1414, %v418_v7   ;;  %476 = vperm.xlu1 %1415, %v417_v8   ;;  %v423_v31 = vld [vmem:[%s2047_s0 + $0x98] sm:$0xff]  ;;  %v422_v32 = vld [vmem:[%s2047_s0 + $0x90] sm:$0xff]  ;;  %v405_v33 = vld [vmem:[%s2047_s0 + $0x8] sm:$0xff] }
  0x16   : > { %v404_v34 = vld [vmem:[%s2047_s0] sm:$0xff]  ;;  %v421_v35 = vld [vmem:[%s2047_s0 + $0x88] sm:$0xff] }
  0x17   : > { %473 = vperm.xlu2 %1416, %v416_v9   ;;  %v420_v36 = vld [vmem:[%s2047_s0 + $0x80] sm:$0xff] }
  0x18   : > { %1247 = vmatmul.msk.f32.gmra.mxu0 %vm354_vm1, %v353_v10  ;;  %v724_v37 = vld [vmem:[%s2050_s3] sm:$0xf] }
  0x1d   : > { %524 = vperm.xlu0 %1414, %v433_v11   ;;  %470 = vperm.xlu1 %1415, %v415_v12  }
  0x1f   : > { %521 = vperm.xlu2 %1416, %v432_v13  }
  0x25   : > { %518 = vperm.xlu1 %1415, %v431_v14   ;;  %467 = vperm.xlu0 %1414, %v414_v15  }
  0x27   : > { %464 = vperm.xlu2 %1416, %v413_v16  }
  0x2d   : > { %515 = vperm.xlu0 %1414, %v430_v17   ;;  %461 = vperm.xlu1 %1415, %v412_v18  }
  0x2f   : > { %512 = vperm.xlu2 %1416, %v429_v19  }
  0x35   : > { %509 = vperm.xlu1 %1415, %v428_v20   ;;  %458 = vperm.xlu0 %1414, %v411_v21   ;;  %v725_v20 = vld [vmem:[%s2048_s1] sm:$0x3] }
  0x36   : > { %v733_v21 = vperm.slane %v725_v20, 1 }
  0x37   : > { %455 = vperm.xlu2 %1416, %v410_v22  }
  0x3d   : > { %506 = vperm.xlu0 %1414, %v427_v23   ;;  %452 = vperm.xlu1 %1415, %v409_v24  }
  0x3f   : > { %503 = vperm.xlu2 %1416, %v426_v25  }
  0x45   : > { %500 = vperm.xlu1 %1415, %v425_v26   ;;  %449 = vperm.xlu0 %1414, %v408_v27  }
  0x47   : > { %446 = vperm.xlu2 %1416, %v407_v28   ;;  %v821_v28 = vld.sshfl [vmem:[#allocation1 + $0x8] sm:$0xff pattern:$0x75316420] }
  0x4d   : > { %497 = vperm.xlu0 %1414, %v424_v29   ;;  %443 = vperm.xlu1 %1415, %v406_v30   ;;  %v732_v30 = vperm.slane %v725_v20, 0 }
  0x4f   : > { %494 = vperm.xlu2 %1416, %v423_v31  }
  0x55   : > { %491 = vperm.xlu1 %1415, %v422_v32   ;;  %440 = vperm.xlu0 %1414, %v405_v33  }
  0x57   : > { %437 = vperm.xlu2 %1416, %v404_v34  }
  0x5d   : > { %488 = vperm.xlu0 %1414, %v421_v35  }
  0x5f   : > { %485 = vperm.xlu2 %1416, %v420_v36  }
  0x65   : > { %728 = vperm.xlu0 %1414, %v724_v37  }
  0x69   : > { %v528_v38 = vpop.permute.xlu2 %527 }
  0x6a   : > { %vm592_vm12 = vcmp.eq.s32.totalorder %v1617_v44, %v528_v38  ;;  %vm593_vm13 = vcmp.eq.s32.totalorder %v1620_v45, %v528_v38  ;;  %v820_v38 = vld.sshfl [vmem:[#allocation1] sm:$0xff pattern:$0x75316420] }
  0x71   : > { %v474_v39 = vpop.permute.xlu2 %473 }
  0x72   : > { %vm556_vm10 = vcmp.eq.s32.totalorder %v1617_v44, %v474_v39  ;;  %vm557_vm11 = vcmp.eq.s32.totalorder %v1620_v45, %v474_v39 }
  0x79   : > { %v522_v40 = vpop.permute.xlu2 %521 }
  0x7f   : > { %v531_v41 = vpop.permute.xlu1 %530  ;;  %v483_v42 = vpop.permute.xlu0 %482 }
  0x80   : > { %vm562_vm2 = vcmp.eq.s32.totalorder %v1617_v44, %v483_v42  ;;  %vm563_vm3 = vcmp.eq.s32.totalorder %v1620_v45, %v483_v42  ;;  %vm594_vm4 = vcmp.eq.s32.totalorder %v1617_v44, %v531_v41  ;;  %vm595_vm9 = vcmp.eq.s32.totalorder %v1620_v45, %v531_v41 }
  0x81   : > { %1312 = vmatpush.msk.msra.mxu1 %vm562_vm2, %v1431_v48  ;;  %1344 = vmatpush.msk.msra.mxu3 %vm563_vm3, %v1431_v48  ;;  %v465_v49 = vpop.permute.xlu2 %464  ;;  %vm588_vm3 = vcmp.eq.s32.totalorder %v1617_v44, %v522_v40 }
  0x82   : > { %1328 = vmatpush.msk.msra.mxu2 %vm594_vm4, %v1431_v48  ;;  %1360 = vmatpush.msk.msrb.mxu0 %vm595_vm9, %v1431_v48  ;;  %vm589_vm4 = vcmp.eq.s32.totalorder %v1620_v45, %v522_v40 }
  0x84   : > { %1329 = vmatpush.msk.msra.mxu2 %vm592_vm12, %v1431_v48  ;;  %1361 = vmatpush.msk.msrb.mxu0 %vm593_vm13, %v1431_v48 }
  0x87   : > { %v480_v46 = vpop.permute.xlu0 %479  ;;  %v477_v47 = vpop.permute.xlu1 %476 }
  0x88   : > { %vm560_vm5 = vcmp.eq.s32.totalorder %v1617_v44, %v480_v46  ;;  %vm561_vm6 = vcmp.eq.s32.totalorder %v1620_v45, %v480_v46  ;;  %vm558_vm7 = vcmp.eq.s32.totalorder %v1617_v44, %v477_v47  ;;  %vm559_vm8 = vcmp.eq.s32.totalorder %v1620_v45, %v477_v47  ;;  %v1804_v47 = vld [vmem:[%s2053_s6 + $0x10] sm:$0x3] }
  0x89   : > { %1313 = vmatpush.msk.msra.mxu1 %vm560_vm5, %v1431_v48  ;;  %1345 = vmatpush.msk.msra.mxu3 %vm561_vm6, %v1431_v48  ;;  %v513_v53 = vpop.permute.xlu2 %512  ;;  %vm550_vm5 = vcmp.eq.s32.totalorder %v1617_v44, %v465_v49  ;;  %vm551_vm6 = vcmp.eq.s32.totalorder %v1620_v45, %v465_v49 }
  0x8b   : > { %1314 = vmatpush.msk.msra.mxu1 %vm558_vm7, %v1431_v48  ;;  %1346 = vmatpush.msk.msra.mxu3 %vm559_vm8, %v1431_v48 }
  0x8d   : > { %1315 = vmatpush.msk.msra.mxu1 %vm556_vm10, %v1431_v48  ;;  %1347 = vmatpush.msk.msra.mxu3 %vm557_vm11, %v1431_v48  ;;  %v1646_v52 = vpop.f32.mrf.mxu0 }
  0x8e   : > { %v389_v57 = vrot.slane %v1646_v52, 4 }
  0x8f   : > { %v525_v50 = vpop.permute.xlu0 %524  ;;  %v471_v51 = vpop.permute.xlu1 %470 }
  0x90   : > { %vm554_vm14 = vcmp.eq.s32.totalorder %v1617_v44, %v471_v51  ;;  %vm555_vm15 = vcmp.eq.s32.totalorder %v1620_v45, %v471_v51  ;;  %vm590_vm1 = vcmp.eq.s32.totalorder %v1617_v44, %v525_v50  ;;  %vm591_vm2 = vcmp.eq.s32.totalorder %v1620_v45, %v525_v50  ;;  %v1809_v50 = vld [vmem:[%s2053_s6 + $0xe] sm:$0x3] }
  0x91   : > { %1316 = vmatpush.msk.msra.mxu1 %vm554_vm14, %v1431_v48  ;;  %1348 = vmatpush.msk.msra.mxu3 %vm555_vm15, %v1431_v48  ;;  %v456_v60 = vpop.permute.xlu2 %455  ;;  %vm582_vm15 = vcmp.eq.s32.totalorder %v1617_v44, %v513_v53  ;;  %v954_v51 = vperm.slane %v1804_v47, 1 }
  0x92   : > { %1330 = vmatpush.msk.msra.mxu2 %vm590_vm1, %v1431_v48  ;;  %1362 = vmatpush.msk.msrb.mxu0 %vm591_vm2, %v1431_v48  ;;  %vm583_vm1 = vcmp.eq.s32.totalorder %v1620_v45, %v513_v53  ;;  %vm544_vm2 = vcmp.eq.s32.totalorder %v1617_v44, %v456_v60 }
  0x94   : > { %1331 = vmatpush.msk.msra.mxu2 %vm588_vm3, %v1431_v48  ;;  %1363 = vmatpush.msk.msrb.mxu0 %vm589_vm4, %v1431_v48  ;;  %vm545_vm3 = vcmp.eq.s32.totalorder %v1620_v45, %v456_v60 }
  0x95   : > { %v1662_v56 = vpop.f32.mrf.mxu0 }
  0x96   : > { %v394_v58 = vrot.slane %v1662_v56, 4 }
  0x97   : > { %v519_v54 = vpop.permute.xlu1 %518  ;;  %v468_v55 = vpop.permute.xlu0 %467 }
  0x98   : > { %vm552_vm7 = vcmp.eq.s32.totalorder %v1617_v44, %v468_v55  ;;  %vm553_vm8 = vcmp.eq.s32.totalorder %v1620_v45, %v468_v55  ;;  %vm586_vm9 = vcmp.eq.s32.totalorder %v1617_v44, %v519_v54  ;;  %vm587_vm10 = vcmp.eq.s32.totalorder %v1620_v45, %v519_v54 }
  0x99   : > { %1317 = vmatpush.msk.msra.mxu1 %vm552_vm7, %v1431_v48  ;;  %1349 = vmatpush.msk.msra.mxu3 %vm553_vm8, %v1431_v48  ;;  %v1417_v59 = vpack.i.bf16 %v394_v58, %v389_v57  ;;  %v504_v63 = vpop.permute.xlu2 %503  ;;  %v937_v55 = vperm.slane %v1809_v50, 0 }
  0x9a   : > { %1332 = vmatpush.msk.msra.mxu2 %vm586_vm9, %v1431_v48  ;;  %1364 = vmatpush.msk.msrb.mxu0 %vm587_vm10, %v1431_v48 }
  0x9b   : > { %1318 = vmatpush.msk.msra.mxu1 %vm550_vm5, %v1431_v48  ;;  %1350 = vmatpush.msk.msra.mxu3 %vm551_vm6, %v1431_v48 }
  0x9c   : > { %1418 = vrot.lane.b32.xlu1 %v1417_v59, %s1432_s16 }
  0x9f   : > { %v516_v61 = vpop.permute.xlu0 %515  ;;  %v462_v62 = vpop.permute.xlu1 %461 }
  0xa0   : > { %vm548_vm11 = vcmp.eq.s32.totalorder %v1617_v44, %v462_v62  ;;  %vm549_vm12 = vcmp.eq.s32.totalorder %v1620_v45, %v462_v62  ;;  %vm584_vm13 = vcmp.eq.s32.totalorder %v1617_v44, %v516_v61  ;;  %vm585_vm14 = vcmp.eq.s32.totalorder %v1620_v45, %v516_v61 }
  0xa1   : > { %1319 = vmatpush.msk.msra.mxu1 %vm548_vm11, %v1431_v48  ;;  %1351 = vmatpush.msk.msra.mxu3 %vm549_vm12, %v1431_v48  ;;  %v447_v4 = vpop.permute.xlu2 %446  ;;  %vm576_vm12 = vcmp.eq.s32.totalorder %v1617_v44, %v504_v63 }
  0xa2   : > { %1333 = vmatpush.msk.msra.mxu2 %vm584_vm13, %v1431_v48  ;;  %1365 = vmatpush.msk.msrb.mxu0 %vm585_vm14, %v1431_v48  ;;  %vm577_vm13 = vcmp.eq.s32.totalorder %v1620_v45, %v504_v63  ;;  %vm538_vm14 = vcmp.eq.s32.totalorder %v1617_v44, %v447_v4 }
  0xa4   : > { %1334 = vmatpush.msk.msra.mxu2 %vm582_vm15, %v1431_v48  ;;  %1366 = vmatpush.msk.msrb.mxu0 %vm583_vm1, %v1431_v48  ;;  %vm539_vm15 = vcmp.eq.s32.totalorder %v1620_v45, %v447_v4 }
  0xa7   : > { %v510_v0 = vpop.permute.xlu1 %509  ;;  %v459_v1 = vpop.permute.xlu0 %458 }
  0xa8   : > { %vm546_vm4 = vcmp.eq.s32.totalorder %v1617_v44, %v459_v1  ;;  %vm547_vm5 = vcmp.eq.s32.totalorder %v1620_v45, %v459_v1  ;;  %vm580_vm6 = vcmp.eq.s32.totalorder %v1617_v44, %v510_v0  ;;  %vm581_vm7 = vcmp.eq.s32.totalorder %v1620_v45, %v510_v0 }
  0xa9   : > { %1320 = vmatpush.msk.msra.mxu1 %vm546_vm4, %v1431_v48  ;;  %1352 = vmatpush.msk.msra.mxu3 %vm547_vm5, %v1431_v48  ;;  %v495_v7 = vpop.permute.xlu2 %494 }
  0xaa   : > { %1335 = vmatpush.msk.msra.mxu2 %vm580_vm6, %v1431_v48  ;;  %1367 = vmatpush.msk.msrb.mxu0 %vm581_vm7, %v1431_v48 }
  0xab   : > { %1321 = vmatpush.msk.msra.mxu1 %vm544_vm2, %v1431_v48  ;;  %1353 = vmatpush.msk.msra.mxu3 %vm545_vm3, %v1431_v48 }
  0xaf   : > { %v507_v2 = vpop.permute.xlu0 %506  ;;  %v453_v3 = vpop.permute.xlu1 %452 }
  0xb0   : > { %vm542_vm8 = vcmp.eq.s32.totalorder %v1617_v44, %v453_v3  ;;  %vm543_vm9 = vcmp.eq.s32.totalorder %v1620_v45, %v453_v3  ;;  %vm578_vm10 = vcmp.eq.s32.totalorder %v1617_v44, %v507_v2  ;;  %vm579_vm11 = vcmp.eq.s32.totalorder %v1620_v45, %v507_v2  ;;  %v1844_v3 = vld [vmem:[%s2053_s6 + $0xa] sm:$0x3] }
  0xb1   : > { %1322 = vmatpush.msk.msra.mxu1 %vm542_vm8, %v1431_v48  ;;  %1354 = vmatpush.msk.msra.mxu3 %vm543_vm9, %v1431_v48  ;;  %vm570_vm9 = vcmp.eq.s32.totalorder %v1617_v44, %v495_v7  ;;  %v438_v10 = vpop.permute.xlu2 %437 }
  0xb2   : > { %1336 = vmatpush.msk.msra.mxu2 %vm578_vm10, %v1431_v48  ;;  %1368 = vmatpush.msk.msrb.mxu0 %vm579_vm11, %v1431_v48  ;;  %vm571_vm10 = vcmp.eq.s32.totalorder %v1620_v45, %v495_v7  ;;  %vm532_vm11 = vcmp.eq.s32.totalorder %v1617_v44, %v438_v10 }
  0xb4   : > { %1337 = vmatpush.msk.msra.mxu2 %vm576_vm12, %v1431_v48  ;;  %1369 = vmatpush.msk.msrb.mxu0 %vm577_vm13, %v1431_v48 }
  0xb7   : > { %v501_v5 = vpop.permute.xlu1 %500  ;;  %v450_v6 = vpop.permute.xlu0 %449 }
  0xb8   : > { %vm540_vm1 = vcmp.eq.s32.totalorder %v1617_v44, %v450_v6  ;;  %vm541_vm2 = vcmp.eq.s32.totalorder %v1620_v45, %v450_v6  ;;  %vm574_vm3 = vcmp.eq.s32.totalorder %v1617_v44, %v501_v5  ;;  %vm575_vm4 = vcmp.eq.s32.totalorder %v1620_v45, %v501_v5 }
  0xb9   : > { %1323 = vmatpush.msk.msra.mxu1 %vm540_vm1, %v1431_v48  ;;  %1355 = vmatpush.msk.msra.mxu3 %vm541_vm2, %v1431_v48  ;;  %vm533_vm1 = vcmp.eq.s32.totalorder %v1620_v45, %v438_v10  ;;  %v486_v13 = vpop.permute.xlu2 %485  ;;  %v906_v10 = vperm.slane %v1844_v3, 1 }
  0xba   : > { %1338 = vmatpush.msk.msra.mxu2 %vm574_vm3, %v1431_v48  ;;  %1370 = vmatpush.msk.msrb.mxu0 %vm575_vm4, %v1431_v48  ;;  %vm564_vm4 = vcmp.eq.s32.totalorder %v1617_v44, %v486_v13 }
  0xbb   : > { %1324 = vmatpush.msk.msra.mxu1 %vm538_vm14, %v1431_v48  ;;  %1356 = vmatpush.msk.msra.mxu3 %vm539_vm15, %v1431_v48 }
  0xbf   : > { %v498_v8 = vpop.permute.xlu0 %497  ;;  %v444_v9 = vpop.permute.xlu1 %443 }
  0xc0   : > { %vm536_vm5 = vcmp.eq.s32.totalorder %v1617_v44, %v444_v9  ;;  %vm537_vm6 = vcmp.eq.s32.totalorder %v1620_v45, %v444_v9  ;;  %vm572_vm7 = vcmp.eq.s32.totalorder %v1617_v44, %v498_v8  ;;  %vm573_vm8 = vcmp.eq.s32.totalorder %v1620_v45, %v498_v8 }
  0xc1   : > { %1325 = vmatpush.msk.msra.mxu1 %vm536_vm5, %v1431_v48  ;;  %1357 = vmatpush.msk.msra.mxu3 %vm537_vm6, %v1431_v48  ;;  %vm565_vm5 = vcmp.eq.s32.totalorder %v1620_v45, %v486_v13  ;;  %vm398_vm6 = vcmask 523264   ;;  %v905_v9 = vperm.slane %v1844_v3, 0 }
  0xc2   : > { %1339 = vmatpush.msk.msra.mxu2 %vm572_vm7, %v1431_v48  ;;  %1371 = vmatpush.msk.msrb.mxu0 %vm573_vm8, %v1431_v48  ;;  %vm964_vm7 = vcmask 1040384   ;;  %vm931_vm8 = vcmp.lt.s32.totalorder %v1617_v44, 112 }
  0xc4   : > { %1340 = vmatpush.msk.msra.mxu2 %vm570_vm9, %v1431_v48  ;;  %1372 = vmatpush.msk.msrb.mxu0 %vm571_vm10, %v1431_v48  ;;  %vm947_vm9 = vcmp.lt.s32.totalorder %v1617_v44, 111  ;;  %vm915_vm10 = vcmp.lt.s32.totalorder %v1617_v44, 113 }
  0xc7   : > { %v492_v11 = vpop.permute.xlu1 %491  ;;  %v441_v12 = vpop.permute.xlu0 %440 }
  0xc8   : > { %vm534_vm12 = vcmp.eq.s32.totalorder %v1617_v44, %v441_v12  ;;  %vm568_vm13 = vcmp.eq.s32.totalorder %v1617_v44, %v492_v11  ;;  %vm535_vm14 = vcmp.eq.s32.totalorder %v1620_v45, %v441_v12  ;;  %vm569_vm15 = vcmp.eq.s32.totalorder %v1620_v45, %v492_v11  ;;  %v1860_v11 = vld [vmem:[%s2053_s6 + $0x6] sm:$0x3] }
  0xc9   : > { %1326 = vmatpush.msk.msra.mxu1 %vm534_vm12, %v1431_v48  ;;  %1341 = vmatpush.msk.msra.mxu2 %vm568_vm13, %v1431_v48  ;;  %vm883_vm12 = vcmp.lt.s32.totalorder %v1617_v44, 1  ;;  %vm867_vm13 = vcmp.lt.s32.totalorder %v1617_v44, 15  ;;  %v890_v20 = vperm.slane %v1860_v11, 1 }
  0xca   : > { %1358 = vmatpush.msk.msra.mxu3 %vm535_vm14, %v1431_v48  ;;  %1373 = vmatpush.msk.msrb.mxu0 %vm569_vm15, %v1431_v48  ;;  %vm851_vm14 = vcmp.lt.s32.totalorder %v1617_v44, 16  ;;  %vm836_vm15 = vcmp.lt.s32.totalorder %v1617_v44, 17 }
  0xcb   : > { %1327 = vmatpush.msk.msra.mxu1 %vm532_vm11, %v1431_v48  ;;  %vm899_vm11 = vcmp.lt.s32.totalorder %v1617_v44, 127 }
  0xcc   : > { %1359 = vmatpush.msk.msra.mxu3 %vm533_vm1, %v1431_v48  ;;  %vm960_vm1 = vcmask 596992  }
  0xcd   : > { %1383 = vmatpush.msk.msrb.mxu1 %vm964_vm7, %v1431_v48 }
  0xcf   : > { %v489_v14 = vpop.permute.xlu0 %488 }
  0xd0   : > { %vm566_vm2 = vcmp.eq.s32.totalorder %v1617_v44, %v489_v14  ;;  %vm567_vm3 = vcmp.eq.s32.totalorder %v1620_v45, %v489_v14 }
  0xd1   : > { %1342 = vmatpush.msk.msra.mxu2 %vm566_vm2, %v1431_v48  ;;  %1374 = vmatpush.msk.msrb.mxu0 %vm567_vm3, %v1431_v48  ;;  %vm1113_vm2 = vcmask 1044480   ;;  %vm1109_vm3 = vcmask 302080  }
  0xd3   : > { %1343 = vmatpush.msk.msra.mxu2 %vm564_vm4, %v1431_v48  ;;  %1375 = vmatpush.msk.msrb.mxu0 %vm565_vm5, %v1431_v48 }
  0xd5   : > { %1385 = vmatpush.msk.msrb.mxu2 %vm964_vm7, %v1431_v48  ;;  %v953_v48 = vperm.slane %v1804_v47, 0 }
  0xd7   : > { %v729_v22 = vpop.permute.xlu0 %728 }
  0xd8   : > { %v737_v23 = vmul.f32 %v733_v21, %v729_v22  ;;  %v736_v33 = vmul.f32 %v732_v30, %v729_v22 }
 0x10e   : > { %v1419_v15 = vpop.permute.xlu1 %1418 }
 0x10f   : > { %v1421_v16 = vunpack.i.h.bf16 %v1419_v15  ;;  %v1420_v17 = vunpack.i.l.bf16 %v1419_v15 }
 0x111   : > { %v399_v18 = vsel %vm398_vm6, %v1646_v52, %v1420_v17  ;;  %v400_v19 = vsel %vm398_vm6, %v1662_v56, %v1421_v16  ;;  %v1818_v52 = vld [vmem:[%s2053_s6 + $0xc] sm:$0x3]  ;;  %v938_v56 = vperm.slane %v1809_v50, 1  ;;  %v1871_v16 = vld [vmem:[%s2053_s6 + $0x4] sm:$0x3] }
 0x112   : > { %754 = vmatmul.f32.vlgmr.msra.gmra.mxu1 %v399_v18  ;;  %774 = vmatmul.f32.vlgmr.msra.gmra.mxu2 %v400_v19  ;;  %v921_v63 = vperm.slane %v1818_v52, 0  ;;  %v922_v0 = vperm.slane %v1818_v52, 1 }
 0x113   : > { %794 = vmatmul.f32.vlgmr.msra.gmra.mxu3 %v399_v18  ;;  %814 = vmatmul.f32.vlgmr.msrb.gmra.mxu0 %v400_v19  ;;  %v889_v19 = vperm.slane %v1860_v11, 0 }
 0x18f   : > { %v755_v32 = vpop.f32.mrf.mxu1 }
 0x190   : > { %v815_v26 = vpop.f32.mrf.mxu0  ;;  %v756_v35 = vadd.f32 %v755_v32, %v736_v33 }
 0x195   : > { %v775_v34 = vpop.f32.mrf.mxu2 }
 0x196   : > { %v795_v24 = vpop.f32.mrf.mxu3  ;;  %v776_v36 = vadd.f32 %v775_v34, %v756_v35 }
 0x197   : > { %v796_v25 = vadd.f32 %v795_v24, %v737_v23  ;;  %v1886_v23 = vld [vmem:[%s2053_s6 + $0x2] sm:$0x3]  ;;  %v873_v24 = vperm.slane %v1871_v16, 0 }
 0x198   : > { %v826_v37 = vrot.slane %v776_v36, 4  ;;  %v857_v30 = vperm.slane %v1886_v23, 0  ;;  %v858_v32 = vperm.slane %v1886_v23, 1 }
 0x199   : > { %v816_v27 = vadd.f32 %v815_v26, %v796_v25  ;;  %v874_v25 = vperm.slane %v1871_v16, 1 }
 0x19a   : > { %v1777_v39 = vsel %vm361_vm0, %v820_v38, %v826_v37 }
 0x19b   : > { %v827_v29 = vrot.slane %v816_v27, 4 }
 0x19d   : > { %v1762_v31 = vsel %vm361_vm0, %v821_v28, %v827_v29 }
 0x19e   : > { %913 = vrot.lane.b32.xlu0 %v1762_v31, %s1433_s20  ;;  %929 = vrot.lane.b32.xlu1 %v1762_v31, %s1434_s21 }
 0x19f   : > { %945 = vrot.lane.b32.xlu2 %v1762_v31, %s1435_s22 }
 0x1a6   : > { %865 = vrot.lane.b32.xlu0 %v1762_v31, %s1436_s23  ;;  %881 = vrot.lane.b32.xlu1 %v1762_v31, %s1437_s24 }
 0x1a7   : > { %897 = vrot.lane.b32.xlu2 %v1762_v31, %s1438_s25 }
 0x1ae   : > { %927 = vrot.lane.b32.xlu0 %v1777_v39, %s1434_s21  ;;  %943 = vrot.lane.b32.xlu1 %v1777_v39, %s1435_s22 }
 0x1af   : > { %911 = vrot.lane.b32.xlu2 %v1777_v39, %s1433_s20 }
 0x1b6   : > { %879 = vrot.lane.b32.xlu0 %v1777_v39, %s1437_s24  ;;  %895 = vrot.lane.b32.xlu1 %v1777_v39, %s1438_s25 }
 0x1b7   : > { %863 = vrot.lane.b32.xlu2 %v1777_v39, %s1436_s23 }
 0x1be   : > { %832 = vrot.lane.b32.xlu0 %v1777_v39, %s1439_s26  ;;  %847 = vrot.lane.b32.xlu1 %v1777_v39, %s1440_s27 }
 0x1bf   : > { %849 = vrot.lane.b32.xlu2 %v1762_v31, %s1440_s27 }
 0x1c6   : > { %834 = vrot.lane.b32.xlu1 %v1762_v31, %s1439_s26 }
 0x1f9   : > { %v946_v40 = vpop.permute.xlu2 %945 }
 0x201   : > { %v898_v43 = vpop.permute.xlu2 %897 }
 0x209   : > { %v912_v49 = vpop.permute.xlu2 %911 }
 0x210   : > { %v914_v41 = vpop.permute.xlu0 %913  ;;  %v930_v42 = vpop.permute.xlu1 %929 }
 0x211   : > { %v916_v1 = vsel %vm915_vm10, %v912_v49, %v914_v41  ;;  %v917_v2 = vsel %vm915_vm10, %v914_v41, %v912_v49  ;;  %v864_v6 = vpop.permute.xlu2 %863 }
 0x212   : > { %v925_v7 = vmul.f32 %v921_v63, %v916_v1  ;;  %v926_v8 = vmul.f32 %v922_v0, %v917_v2 }
 0x218   : > { %v866_v45 = vpop.permute.xlu0 %865  ;;  %v882_v46 = vpop.permute.xlu1 %881 }
 0x219   : > { %v868_v26 = vsel %vm867_vm13, %v864_v6, %v866_v45  ;;  %v869_v27 = vsel %vm867_vm13, %v866_v45, %v864_v6  ;;  %v850_v33 = vpop.permute.xlu2 %849 }
 0x21a   : > { %v877_v35 = vmul.f32 %v873_v24, %v869_v27 }
 0x220   : > { %v928_v53 = vpop.permute.xlu0 %927  ;;  %v944_v54 = vpop.permute.xlu1 %943 }
 0x221   : > { %v932_v57 = vsel %vm931_vm8, %v928_v53, %v930_v42  ;;  %v933_v58 = vsel %vm931_vm8, %v930_v42, %v928_v53  ;;  %v948_v59 = vsel %vm947_vm9, %v944_v54, %v946_v40  ;;  %v949_v60 = vsel %vm947_vm9, %v946_v40, %v944_v54  ;;  %v1918_v40 = vld [vmem:[%s2053_s6] sm:$0x3] }
 0x222   : > { %v957_v61 = vmul.f32 %v953_v48, %v948_v59  ;;  %v958_v62 = vmul.f32 %v954_v51, %v949_v60  ;;  %v941_v4 = vmul.f32 %v937_v55, %v932_v57  ;;  %v942_v5 = vmul.f32 %v938_v56, %v933_v58  ;;  %v959_v57 = vld [vmem:[%s2051_s4] sm:$0xf] }
 0x223   : > { %v841_v41 = vperm.slane %v1918_v40, 0  ;;  %v842_v42 = vperm.slane %v1918_v40, 1  ;;  %v1108_v40 = vld [vmem:[%s2052_s5] sm:$0xf] }
 0x224   : > { %975 = vmatpush.msrb.mxu1 %v957_v61  ;;  %995 = vmatpush.msrb.mxu2 %v958_v62 }
 0x226   : > { %976 = vmatpush.msrb.mxu1 %v941_v4  ;;  %996 = vmatpush.msrb.mxu2 %v942_v5 }
 0x228   : > { %v880_v12 = vpop.permute.xlu0 %879  ;;  %977 = vmatpush.msrb.mxu1 %v925_v7  ;;  %997 = vmatpush.msrb.mxu2 %v926_v8  ;;  %v896_v13 = vpop.permute.xlu1 %895 }
 0x229   : > { %v900_v14 = vsel %vm899_vm11, %v896_v13, %v898_v43  ;;  %v901_v15 = vsel %vm899_vm11, %v898_v43, %v896_v13  ;;  %v884_v21 = vsel %vm883_vm12, %v880_v12, %v882_v46  ;;  %v885_v22 = vsel %vm883_vm12, %v882_v46, %v880_v12 }
 0x22a   : > { %v909_v17 = vmul.f32 %v905_v9, %v900_v14  ;;  %v910_v18 = vmul.f32 %v906_v10, %v901_v15  ;;  %v893_v28 = vmul.f32 %v889_v19, %v885_v22  ;;  %v894_v29 = vmul.f32 %v890_v20, %v884_v21 }
 0x22c   : > { %978 = vmatpush.msrb.mxu1 %v909_v17  ;;  %998 = vmatpush.msrb.mxu2 %v910_v18 }
 0x22e   : > { %979 = vmatpush.msrb.mxu1 %v1777_v39  ;;  %999 = vmatpush.msrb.mxu2 %v1762_v31  ;;  %v878_v31 = vmul.f32 %v874_v25, %v868_v26 }
 0x230   : > { %980 = vmatpush.msrb.mxu1 %v893_v28  ;;  %1000 = vmatpush.msrb.mxu2 %v894_v29  ;;  %v848_v34 = vpop.permute.xlu1 %847  ;;  %v833_v43 = vpop.permute.xlu0 %832 }
 0x231   : > { %v852_v36 = vsel %vm851_vm14, %v848_v34, %v850_v33  ;;  %v853_v37 = vsel %vm851_vm14, %v850_v33, %v848_v34 }
 0x232   : > { %981 = vmatpush.msrb.mxu1 %v877_v35  ;;  %1001 = vmatpush.msrb.mxu2 %v878_v31  ;;  %v861_v38 = vmul.f32 %v857_v30, %v853_v37  ;;  %v862_v39 = vmul.f32 %v858_v32, %v852_v36 }
 0x234   : > { %982 = vmatpush.msrb.mxu1 %v861_v38  ;;  %1002 = vmatpush.msrb.mxu2 %v862_v39 }
 0x238   : > { %v835_v45 = vpop.permute.xlu1 %834 }
 0x239   : > { %v837_v46 = vsel %vm836_vm15, %v833_v43, %v835_v45  ;;  %v838_v49 = vsel %vm836_vm15, %v835_v45, %v833_v43 }
 0x23a   : > { %v845_v53 = vmul.f32 %v841_v41, %v838_v49  ;;  %v846_v54 = vmul.f32 %v842_v42, %v837_v46 }
 0x23c   : > { %983 = vmatpush.msrb.mxu1 %v845_v53  ;;  %1003 = vmatpush.msrb.mxu2 %v846_v54 }
 0x23d   : > { %1384 = vmatmul.msk.f32.vlgmr.msrb.gmra.mxu1 %vm960_vm1, %v959_v57  ;;  %1386 = vmatmul.msk.f32.vlgmr.msrb.gmra.mxu2 %vm960_vm1, %v959_v57 }
 0x2ba   : > { %v985_v58 = vpop.f32.mrf.mxu1 }
 0x2bb   : > { %v1934_v59 = vmax.f32 %v985_v58, 0.0 }
 0x2bd   : > { %1042 = vrot.lane.b32.xlu0 %v1934_v59, %s1438_s25  ;;  %1066 = vrot.lane.b32.xlu1 %v1934_v59, %s1435_s22 }
 0x2be   : > { %1058 = vrot.lane.b32.xlu2 %v1934_v59, %s1434_s21 }
 0x2c0   : > { %v1005_v60 = vpop.f32.mrf.mxu2 }
 0x2c1   : > { %v1009_v61 = vmax.f32 %v1005_v60, 0.0 }
 0x2c5   : > { %1018 = vrot.lane.b32.xlu0 %v1934_v59, %s1440_s27  ;;  %1034 = vrot.lane.b32.xlu1 %v1934_v59, %s1437_s24 }
 0x2c6   : > { %1050 = vrot.lane.b32.xlu2 %v1934_v59, %s1433_s20 }
 0x2cd   : > { %1044 = vrot.lane.b32.xlu1 %v1009_v61, %s1438_s25  ;;  %1060 = vrot.lane.b32.xlu0 %v1009_v61, %s1434_s21 }
 0x2ce   : > { %1026 = vrot.lane.b32.xlu2 %v1934_v59, %s1436_s23 }
 0x2d5   : > { %1020 = vrot.lane.b32.xlu1 %v1009_v61, %s1440_s27  ;;  %1052 = vrot.lane.b32.xlu0 %v1009_v61, %s1433_s20 }
 0x2d6   : > { %1068 = vrot.lane.b32.xlu2 %v1009_v61, %s1435_s22 }
 0x2dd   : > { %1010 = vrot.lane.b32.xlu1 %v1934_v59, %s1439_s26  ;;  %1028 = vrot.lane.b32.xlu0 %v1009_v61, %s1436_s23 }
 0x2de   : > { %1036 = vrot.lane.b32.xlu2 %v1009_v61, %s1437_s24  ;;  %s349_s24 = scalar_lea.vmem %s2056_s9, %s1393_s18 }
 0x2e6   : > { %1012 = vrot.lane.b32.xlu2 %v1009_v61, %s1439_s26 }
 0x318   : > { %v1059_v62 = vpop.permute.xlu2 %1058 }
 0x320   : > { %v1051_v1 = vpop.permute.xlu2 %1050 }
 0x328   : > { %v1027_v2 = vpop.permute.xlu2 %1026 }
 0x32f   : > { %v1043_v4 = vpop.permute.xlu0 %1042  ;;  %v1067_v5 = vpop.permute.xlu1 %1066 }
 0x330   : > { %v1069_v6 = vpop.permute.xlu2 %1068 }
 0x331   : > { %v1070_v7 = vsel %vm947_vm9, %v1067_v5, %v1069_v6  ;;  %v1071_v8 = vsel %vm947_vm9, %v1069_v6, %v1067_v5 }
 0x332   : > { %v1072_v12 = vmul.f32 %v1070_v7, %v953_v48  ;;  %v1073_v13 = vmul.f32 %v1071_v8, %v954_v51 }
 0x334   : > { %v1107_v14 = vsel %vm361_vm0, %v1073_v13, 1.0  ;;  %v1106_v15 = vsel %vm361_vm0, %v1072_v12, 1.0 }
 0x335   : > { %1387 = vmatpush.msk.msrb.mxu3 %vm1113_vm2, %v1106_v15  ;;  %1389 = vmatpush.msk.msra.mxu0 %vm1113_vm2, %v1107_v14 }
 0x337   : > { %v1019_v17 = vpop.permute.xlu0 %1018  ;;  %v1035_v18 = vpop.permute.xlu1 %1034 }
 0x338   : > { %v1037_v27 = vpop.permute.xlu2 %1036 }
 0x339   : > { %v1038_v35 = vsel %vm883_vm12, %v1035_v18, %v1037_v27  ;;  %v1039_v31 = vsel %vm883_vm12, %v1037_v27, %v1035_v18 }
 0x33a   : > { %v1040_v43 = vmul.f32 %v1039_v31, %v889_v19  ;;  %v1041_v45 = vmul.f32 %v1038_v35, %v890_v20 }
 0x33c   : > { %v1082_v11 = vrot.slane %v1040_v43, 4  ;;  %v1083_v19 = vrot.slane %v1041_v45, 4 }
 0x33f   : > { %v1045_v21 = vpop.permute.xlu1 %1044  ;;  %v1061_v22 = vpop.permute.xlu0 %1060 }
 0x340   : > { %v1046_v26 = vsel %vm899_vm11, %v1043_v4, %v1045_v21  ;;  %v1047_v48 = vsel %vm899_vm11, %v1045_v21, %v1043_v4  ;;  %v1062_v47 = vsel %vm931_vm8, %v1059_v62, %v1061_v22  ;;  %v1063_v51 = vsel %vm931_vm8, %v1061_v22, %v1059_v62 }
 0x341   : > { %v1048_v28 = vmul.f32 %v1046_v26, %v905_v9  ;;  %v1049_v29 = vmul.f32 %v1047_v48, %v906_v10  ;;  %v1064_v33 = vmul.f32 %v1062_v47, %v937_v55  ;;  %v1065_v34 = vmul.f32 %v1063_v51, %v938_v56 }
 0x343   : > { %v1088_v38 = vrot.slane %v1048_v28, 4  ;;  %v1089_v39 = vrot.slane %v1049_v29, 4  ;;  %v1094_v55 = vrot.slane %v1064_v33, 4  ;;  %v1095_v10 = vrot.slane %v1065_v34, 4 }
 0x345   : > { %v1102_v52 = vsel %vm361_vm0, %v1934_v59, %v1088_v38 }
 0x347   : > { %v1021_v36 = vpop.permute.xlu1 %1020  ;;  %v1053_v37 = vpop.permute.xlu0 %1052 }
 0x348   : > { %v1054_v3 = vsel %vm915_vm10, %v1051_v1, %v1053_v37  ;;  %v1055_v9 = vsel %vm915_vm10, %v1053_v37, %v1051_v1  ;;  %v1022_v53 = vsel %vm851_vm14, %v1019_v17, %v1021_v36  ;;  %v1023_v54 = vsel %vm851_vm14, %v1021_v36, %v1019_v17 }
 0x349   : > { %v1056_v50 = vmul.f32 %v1054_v3, %v921_v63  ;;  %v1057_v56 = vmul.f32 %v1055_v9, %v922_v0  ;;  %v1103_v63 = vsel %vm361_vm0, %v1009_v61, %v1089_v39  ;;  %v1013_v0 = vpop.permute.xlu2 %1012  ;;  %v1024_v20 = vmul.f32 %v1023_v54, %v857_v30 }
 0x34a   : > { %v1025_v57 = vmul.f32 %v1022_v53, %v858_v32 }
 0x34b   : > { %v1104_v46 = vsel %vm361_vm0, %v1056_v50, %v1094_v55  ;;  %v1105_v49 = vsel %vm361_vm0, %v1057_v56, %v1095_v10  ;;  %v1076_v5 = vrot.slane %v1024_v20, 4 }
 0x34c   : > { %1132 = vmatpush.msrb.mxu3 %v1104_v46  ;;  %1152 = vmatpush.msra.mxu0 %v1105_v49  ;;  %v1077_v6 = vrot.slane %v1025_v57, 4 }
 0x34e   : > { %1133 = vmatpush.msrb.mxu3 %v1102_v52  ;;  %1153 = vmatpush.msra.mxu0 %v1103_v63 }
 0x34f   : > { %v1011_v58 = vpop.permute.xlu1 %1010  ;;  %v1029_v60 = vpop.permute.xlu0 %1028 }
 0x350   : > { %v1014_v62 = vsel %vm836_vm15, %v1011_v58, %v1013_v0  ;;  %v1015_v59 = vsel %vm836_vm15, %v1013_v0, %v1011_v58  ;;  %v1030_v61 = vsel %vm867_vm13, %v1027_v2, %v1029_v60  ;;  %v1031_v1 = vsel %vm867_vm13, %v1029_v60, %v1027_v2 }
 0x351   : > { %v1016_v30 = vmul.f32 %v1015_v59, %v841_v41  ;;  %v1017_v23 = vmul.f32 %v1014_v62, %v842_v42  ;;  %v1032_v32 = vmul.f32 %v1031_v1, %v873_v24  ;;  %v1033_v4 = vmul.f32 %v1030_v61, %v874_v25 }
 0x353   : > { %v1100_v7 = vsel %vm361_vm0, %v1032_v32, %v1082_v11  ;;  %v1101_v44 = vsel %vm361_vm0, %v1033_v4, %v1083_v19  ;;  %v1098_v41 = vsel %vm361_vm0, %v1016_v30, %v1076_v5  ;;  %v1099_v24 = vsel %vm361_vm0, %v1017_v23, %v1077_v6 }
 0x354   : > { %1134 = vmatpush.msrb.mxu3 %v1100_v7  ;;  %1154 = vmatpush.msra.mxu0 %v1101_v44 }
 0x356   : > { %1135 = vmatpush.msrb.mxu3 %v1098_v41  ;;  %1155 = vmatpush.msra.mxu0 %v1099_v24 }
 0x357   : > { %1388 = vmatmul.msk.f32.vlgmr.msrb.gmra.mxu3 %vm1109_vm3, %v1108_v40  ;;  %1390 = vmatmul.msk.f32.vlgmr.msra.gmra.mxu0 %vm1109_vm3, %v1108_v40 }
 0x3d4   : > { %v1157_v16 = vpop.f32.mrf.mxu0 }
 0x3d5   : > { %v1161_v25 = vmax.f32 %v1157_v16, 0.0 }
 0x3d7   : > { %v1164_v42 = vrot.slane %v1161_v25, 4 }
 0x3da   : > { %v1137_v2 = vpop.f32.mrf.mxu3 }
 0x3db   : > { %v1160_v8 = vmax.f32 %v1137_v2, 0.0 }
 0x3dd   : > { %v1165_v12 = vsel %vm361_vm0, %v1160_v8, %v1164_v42 }
 0x3de   : > { %1167 = vst [vmem:[%s349_s24] sm:$0xff] %v1165_v12 }
 0x3df PF: > { %s19_s30 = sadd.s32 1, %s1428_s30  }
 0x3e0   : > { %p16_p4 = scmp.ge.s32.totalorder %s19_s30, 4  }
 0x3e2   :  { %18 = sbr.rel (!%p16_p4) target bundleno = 1 (0x1), region = 96 }

</bundles_post_ra>
